<compile_context>
chip_gen: v7x
topology: tpu7x:2x2x1
jax: 0.10.0
libtpu: 0.0.40
codegen_flags: <defaults>
</compile_context>

<pallas_src>
import functools

import jax
import jax.numpy as jnp
from jax import lax
from jax.experimental import pallas as pl
from jax.experimental.pallas import tpu as pltpu


def _round_up(v, m):
    return ((v + m - 1) // m) * m


def _pick_tile(padded_dim, max_tile):
    """Largest multiple of 128 that divides padded_dim and is <= max_tile."""
    best = 128
    for t in range(128, min(max_tile, padded_dim) + 1, 128):
        if padded_dim % t == 0:
            best = t
    return best


# ---------------------------------------------------------------- kernels ----

def _noisy_kernel(x_ref, wmu_ref, wsig_ref, ein_ref, eout_ref,
                  bmu_ref, bsig_ref, beps_ref, o_ref):
    k = pl.program_id(2)

    @pl.when(k == 0)
    def _():
        o_ref[...] = jnp.zeros_like(o_ref)

    x = x_ref[...]                                                  # (tb, tk)
    # Contract both operands on their last (lane) dim -> stored [out, in] weight
    # tiles feed the MXU directly, no transpose.
    mu_part = lax.dot_general(
        x, wmu_ref[...],
        dimension_numbers=(((1,), (1,)), ((), ())),
        preferred_element_type=jnp.float32)                         # (tb, tn)
    sig_part = lax.dot_general(
        x * ein_ref[...], wsig_ref[...],
        dimension_numbers=(((1,), (1,)), ((), ())),
        preferred_element_type=jnp.float32)                         # (tb, tn)
    o_ref[...] += mu_part + eout_ref[...] * sig_part

    @pl.when(k == pl.num_programs(2) - 1)
    def _():
        o_ref[...] += bmu_ref[...] + bsig_ref[...] * beps_ref[...]  # (1, tn) broadcast


def _mu_kernel(x_ref, wmu_ref, bmu_ref, o_ref):
    k = pl.program_id(2)

    @pl.when(k == 0)
    def _():
        o_ref[...] = jnp.zeros_like(o_ref)

    o_ref[...] += lax.dot_general(
        x_ref[...], wmu_ref[...],
        dimension_numbers=(((1,), (1,)), ((), ())),
        preferred_element_type=jnp.float32)

    @pl.when(k == pl.num_programs(2) - 1)
    def _():
        o_ref[...] += bmu_ref[...]


# ---------------------------------------------------------------- wrapper ----

@functools.partial(jax.jit,
                   static_argnames=("out_features", "training", "max_tile", "max_tb"))
def noisy_linear(x, padded, out_features, training=True, max_tile=512, max_tb=256):
    """Pallas-backed NoisyLinear forward.

    x:       [B, in_features] float32
    padded:  dict from `pad_noisy_linear` (weights padded to 128-multiples, vectors as
             (1, padded) rows).
    returns: [B, out_features] float32
    """
    B, K = x.shape
    Np, Kp = padded["weight_mu"].shape          # already multiples of 128
    assert K <= Kp and out_features <= Np
    assert x.dtype == jnp.float32               # kernel accumulates into the f32 output block

    # Batch tile (multiple of 8, capped); only x is padded per call (cheap).
    tb = min(_round_up(B, 8), max_tb)
    Bp = _round_up(B, tb)
    tk = _pick_tile(Kp, max_tile)
    tn = _pick_tile(Np, max_tile)

    xp = jnp.pad(x, ((0, Bp - B), (0, Kp - K)))

    grid = (Bp // tb, Np // tn, Kp // tk)       # (batch, out, reduction) -- K last.
    nb, nn, nk = grid

    x_spec = pl.BlockSpec((tb, tk), lambda b, j, k: (b, k))
    w_spec = pl.BlockSpec((tn, tk), lambda b, j, k: (j, k))
    ein_spec = pl.BlockSpec((1, tk), lambda b, j, k: (0, k))
    row_spec = pl.BlockSpec((1, tn), lambda b, j, k: (0, j))    # eps_out / biases
    o_spec = pl.BlockSpec((tb, tn), lambda b, j, k: (b, j))
    cparams = pltpu.CompilerParams(
        dimension_semantics=("parallel", "parallel", "arbitrary"))

    if training:
        cost = pl.CostEstimate(
            flops=4 * Bp * Kp * Np + 3 * Bp * Np * nk + Bp * Kp * nn,
            transcendentals=0,
            bytes_accessed=(2 * Np * Kp * nb            # W_mu + W_sigma (re-read per b tile)
                            + Bp * Kp * nn               # x (re-read per n tile)
                            + Bp * Np + Kp + 4 * Np) * 4)
        out = pl.pallas_call(
            _noisy_kernel,
            out_shape=jax.ShapeDtypeStruct((Bp, Np), jnp.float32),
            grid=grid,
            in_specs=[x_spec, w_spec, w_spec, ein_spec, row_spec,
                      row_spec, row_spec, row_spec],
            out_specs=o_spec,
            compiler_params=cparams,
            cost_estimate=cost,
        )(xp, padded["weight_mu"], padded["weight_sigma"],
          padded["eps_in"], padded["eps_out"],
          padded["bias_mu"], padded["bias_sigma"], padded["bias_epsilon"])
    else:
        # Eval path: mu-only kernel, never touches sigma / epsilon tensors.
        cost = pl.CostEstimate(
            flops=2 * Bp * Kp * Np + Bp * Np * nk,
            transcendentals=0,
            bytes_accessed=(Np * Kp * nb + Bp * Kp * nn + Bp * Np + Np) * 4)
        out = pl.pallas_call(
            _mu_kernel,
            out_shape=jax.ShapeDtypeStruct((Bp, Np), jnp.float32),
            grid=grid,
            in_specs=[x_spec, w_spec, row_spec],
            out_specs=o_spec,
            compiler_params=cparams,
            cost_estimate=cost,
        )(xp, padded["weight_mu"], padded["bias_mu"])

    return out[:B, :out_features]


# ----------------------------------------------------- init (module state) ---

def _scale_noise(key, size):
    # f(x) = sign(x) * sqrt(|x|) applied to standard normal noise.
    x = jax.random.normal(key, (size,), dtype=jnp.float32)
    return jnp.sign(x) * jnp.sqrt(jnp.abs(x))


def init_noisy_linear(key, in_features, out_features, std_init=0.1):
    """Parameters + factorized noise (reset_parameters + reset_noise).

    Noise is kept in factorized form (eps_in, eps_out); the full weight_epsilon buffer of
    the PyTorch module is outer(eps_out, eps_in) and is never materialized for the kernel.
    """
    k_wmu, k_bmu, k_ein, k_eout = jax.random.split(key, 4)
    mu_range = 1.0 / jnp.sqrt(jnp.float32(in_features))

    weight_mu = jax.random.uniform(
        k_wmu, (out_features, in_features), jnp.float32, -mu_range, mu_range)
    weight_sigma = jnp.full((out_features, in_features),
                            std_init / jnp.sqrt(jnp.float32(in_features)),
                            dtype=jnp.float32)
    bias_mu = jax.random.uniform(
        k_bmu, (out_features,), jnp.float32, -mu_range, mu_range)
    bias_sigma = jnp.full((out_features,),
                          std_init / jnp.sqrt(jnp.float32(out_features)),
                          dtype=jnp.float32)

    eps_in = _scale_noise(k_ein, in_features)        # (in,)
    eps_out = _scale_noise(k_eout, out_features)     # (out,)
    bias_epsilon = eps_out                           # (out,)

    return dict(weight_mu=weight_mu, weight_sigma=weight_sigma,
                bias_mu=bias_mu, bias_sigma=bias_sigma,
                eps_in=eps_in, eps_out=eps_out, bias_epsilon=bias_epsilon)


def pad_noisy_linear(params):
    """Pad parameters to 128-multiples ONCE (call after init / reset_noise).

    Keeps the per-call jitted forward free of [N,K] weight-padding copies.
    """
    N, K = params["weight_mu"].shape
    Np, Kp = _round_up(N, 128), _round_up(K, 128)

    def pad_w(w):
        return jnp.pad(w, ((0, Np - N), (0, Kp - K)))

    def pad_row_n(v):
        return jnp.pad(v, (0, Np - N)).reshape(1, Np)

    def pad_row_k(v):
        return jnp.pad(v, (0, Kp - K)).reshape(1, Kp)

    return dict(weight_mu=pad_w(params["weight_mu"]),
                weight_sigma=pad_w(params["weight_sigma"]),
                eps_in=pad_row_k(params["eps_in"]),
                eps_out=pad_row_n(params["eps_out"]),
                bias_mu=pad_row_n(params["bias_mu"]),
                bias_sigma=pad_row_n(params["bias_sigma"]),
                bias_epsilon=pad_row_n(params["bias_epsilon"]))


# -------------------------------------------------------------------- main ---

def _check(name, x, params, padded, training, atol=2e-3, rtol=2e-3, **kw):
    N = params["weight_mu"].shape[0]
    y = noisy_linear(x, padded, out_features=N, training=training, **kw)
    jax.block_until_ready(y)

    w_eps = jnp.outer(params["eps_out"], params["eps_in"])
    if training:
        w_eff = params["weight_mu"] + params["weight_sigma"] * w_eps
        b_eff = params["bias_mu"] + params["bias_sigma"] * params["bias_epsilon"]
    else:
        w_eff = params["weight_mu"]
        b_eff = params["bias_mu"]
    ref = jnp.dot(x, w_eff.T, precision=lax.Precision.HIGHEST) + b_eff
    assert y.shape == ref.shape, f"shape mismatch in {name}"
    assert jnp.allclose(y, ref, atol=atol, rtol=rtol), f"mismatch in {name}"


if __name__ == "__main__":
    key = jax.random.PRNGKey(0)
    k_p1, k_x1, k_p2, k_x2 = jax.random.split(key, 4)

    # Case 1: small layer (single tile) -- B=2, in=32, out=64.
    B, in_features, out_features = 2, 32, 64
    params = init_noisy_linear(k_p1, in_features, out_features, std_init=0.1)
    padded = pad_noisy_linear(params)
    x = jax.random.normal(k_x1, (B, in_features), dtype=jnp.float32)

    _check("train_small", x, params, padded, training=True)
    _check("eval_small", x, params, padded, training=False)

    # Case 2: multi-tile grid exercising all three axes (batch, out, reduction):
    # max_tile=128, max_tb=8 -> grid = (2, 3, 2).
    B2, in2, out2 = 10, 256, 384
    params2 = init_noisy_linear(k_p2, in2, out2, std_init=0.1)
    padded2 = pad_noisy_linear(params2)
    x2 = jax.random.normal(k_x2, (B2, in2), dtype=jnp.float32)

    _check("train_tiled", x2, params2, padded2, training=True, max_tile=128, max_tb=8)
    _check("eval_tiled", x2, params2, padded2, training=False, max_tile=128, max_tb=8)

    print("KERNEL_OK")
</pallas_src>

<mosaic_0001>
module attributes {stable_mosaic.version = 11 : i64} {
  func.func @_noisy_kernel(%arg0: i32, %arg1: i32, %arg2: i32, %arg3: memref<8x128xf32, #tpu.memory_space<vmem>>, %arg4: memref<128x128xf32, #tpu.memory_space<vmem>>, %arg5: memref<128x128xf32, #tpu.memory_space<vmem>>, %arg6: memref<1x128xf32, #tpu.memory_space<vmem>>, %arg7: memref<1x128xf32, #tpu.memory_space<vmem>>, %arg8: memref<1x128xf32, #tpu.memory_space<vmem>>, %arg9: memref<1x128xf32, #tpu.memory_space<vmem>>, %arg10: memref<1x128xf32, #tpu.memory_space<vmem>>, %arg11: memref<8x128xf32, #tpu.memory_space<vmem>>) attributes {dimension_semantics = [#tpu.dimension_semantics<parallel>, #tpu.dimension_semantics<parallel>, #tpu.dimension_semantics<arbitrary>], iteration_bounds = array<i64: 1, 1, 1>, scalar_prefetch = 0 : i64, scratch_operands = 0 : i64, tpu.core_type = #tpu.core_type<tc>, window_params = [{transform_indices = @transform_0, window_bounds = array<i64: 8, 128>}, {transform_indices = @transform_1, window_bounds = array<i64: 128, 128>}, {transform_indices = @transform_2, window_bounds = array<i64: 128, 128>}, {transform_indices = @transform_3, window_bounds = array<i64: 1, 128>}, {transform_indices = @transform_4, window_bounds = array<i64: 1, 128>}, {transform_indices = @transform_5, window_bounds = array<i64: 1, 128>}, {transform_indices = @transform_6, window_bounds = array<i64: 1, 128>}, {transform_indices = @transform_7, window_bounds = array<i64: 1, 128>}, {transform_indices = @transform_8, window_bounds = array<i64: 8, 128>}]} {
    %c0_i32 = arith.constant 0 : i32
    %0 = arith.cmpi eq, %arg2, %c0_i32 : i32
    %1 = arith.extui %0 : i1 to i32
    %c0_i32_0 = arith.constant 0 : i32
    %2 = arith.cmpi ne, %1, %c0_i32_0 : i32
    scf.if %2 {
      %cst_17 = arith.constant 0.000000e+00 : f32
      %21 = vector.broadcast %cst_17 : f32 to vector<8x128xf32>
      %c0_18 = arith.constant 0 : index
      %c0_19 = arith.constant 0 : index
      %22 = vector.load %arg11[%c0_18, %c0_19] : memref<8x128xf32, #tpu.memory_space<vmem>>, vector<8x128xf32>
      tpu.vector_store %arg11[%c0_18, %c0_19], %21 {strides = array<i32>} : memref<8x128xf32, #tpu.memory_space<vmem>>, vector<8x128xf32>,
    } else {
    }
    %c0 = arith.constant 0 : index
    %c0_1 = arith.constant 0 : index
    %3 = vector.load %arg3[%c0, %c0_1] : memref<8x128xf32, #tpu.memory_space<vmem>>, vector<8x128xf32>
    %c0_2 = arith.constant 0 : index
    %c0_3 = arith.constant 0 : index
    %4 = vector.load %arg4[%c0_2, %c0_3] : memref<128x128xf32, #tpu.memory_space<vmem>>, vector<128x128xf32>
    %cst = arith.constant dense<0.000000e+00> : vector<8x128xf32>
    %5 = tpu.matmul %3, %4, %cst {dimension_numbers = #tpu.dot_dimension_numbers<[1], [1], [0], [0], [0, 0, 1, 0], [], []>} : vector<8x128xf32>, vector<128x128xf32>, vector<8x128xf32> -> vector<8x128xf32>
    %c0_4 = arith.constant 0 : index
    %c0_5 = arith.constant 0 : index
    %6 = vector.load %arg6[%c0_4, %c0_5] : memref<1x128xf32, #tpu.memory_space<vmem>>, vector<1x128xf32>
    %7 = vector.broadcast %6 : vector<1x128xf32> to vector<8x128xf32>
    %8 = arith.mulf %3, %7 : vector<8x128xf32>
    %c0_6 = arith.constant 0 : index
    %c0_7 = arith.constant 0 : index
    %9 = vector.load %arg5[%c0_6, %c0_7] : memref<128x128xf32, #tpu.memory_space<vmem>>, vector<128x128xf32>
    %cst_8 = arith.constant dense<0.000000e+00> : vector<8x128xf32>
    %10 = tpu.matmul %8, %9, %cst_8 {dimension_numbers = #tpu.dot_dimension_numbers<[1], [1], [0], [0], [0, 0, 1, 0], [], []>} : vector<8x128xf32>, vector<128x128xf32>, vector<8x128xf32> -> vector<8x128xf32>
    %c0_9 = arith.constant 0 : index
    %c0_10 = arith.constant 0 : index
    %11 = vector.load %arg11[%c0_9, %c0_10] : memref<8x128xf32, #tpu.memory_space<vmem>>, vector<8x128xf32>
    %c0_11 = arith.constant 0 : index
    %c0_12 = arith.constant 0 : index
    %12 = vector.load %arg7[%c0_11, %c0_12] : memref<1x128xf32, #tpu.memory_space<vmem>>, vector<1x128xf32>
    %13 = vector.broadcast %12 : vector<1x128xf32> to vector<8x128xf32>
    %14 = arith.mulf %13, %10 : vector<8x128xf32>
    %15 = arith.addf %5, %14 : vector<8x128xf32>
    %16 = arith.addf %11, %15 : vector<8x128xf32>
    %c0_13 = arith.constant 0 : index
    %c0_14 = arith.constant 0 : index
    %17 = vector.load %arg11[%c0_13, %c0_14] : memref<8x128xf32, #tpu.memory_space<vmem>>, vector<8x128xf32>
    tpu.vector_store %arg11[%c0_13, %c0_14], %16 {strides = array<i32>} : memref<8x128xf32, #tpu.memory_space<vmem>>, vector<8x128xf32>,
    %c0_i32_15 = arith.constant 0 : i32
    %18 = arith.cmpi eq, %arg2, %c0_i32_15 : i32
    %19 = arith.extui %18 : i1 to i32
    %c0_i32_16 = arith.constant 0 : i32
    %20 = arith.cmpi ne, %19, %c0_i32_16 : i32
    scf.if %20 {
      %c0_17 = arith.constant 0 : index
      %c0_18 = arith.constant 0 : index
      %21 = vector.load %arg11[%c0_17, %c0_18] : memref<8x128xf32, #tpu.memory_space<vmem>>, vector<8x128xf32>
      %c0_19 = arith.constant 0 : index
      %c0_20 = arith.constant 0 : index
      %22 = vector.load %arg8[%c0_19, %c0_20] : memref<1x128xf32, #tpu.memory_space<vmem>>, vector<1x128xf32>
      %c0_21 = arith.constant 0 : index
      %c0_22 = arith.constant 0 : index
      %23 = vector.load %arg9[%c0_21, %c0_22] : memref<1x128xf32, #tpu.memory_space<vmem>>, vector<1x128xf32>
      %c0_23 = arith.constant 0 : index
      %c0_24 = arith.constant 0 : index
      %24 = vector.load %arg10[%c0_23, %c0_24] : memref<1x128xf32, #tpu.memory_space<vmem>>, vector<1x128xf32>
      %25 = arith.mulf %23, %24 : vector<1x128xf32>
      %26 = arith.addf %22, %25 : vector<1x128xf32>
      %27 = vector.broadcast %26 : vector<1x128xf32> to vector<8x128xf32>
      %28 = arith.addf %21, %27 : vector<8x128xf32>
      %c0_25 = arith.constant 0 : index
      %c0_26 = arith.constant 0 : index
      %29 = vector.load %arg11[%c0_25, %c0_26] : memref<8x128xf32, #tpu.memory_space<vmem>>, vector<8x128xf32>
      tpu.vector_store %arg11[%c0_25, %c0_26], %28 {strides = array<i32>} : memref<8x128xf32, #tpu.memory_space<vmem>>, vector<8x128xf32>,
    } else {
    }
    return
  }
  func.func @transform_0(%arg0: i32, %arg1: i32, %arg2: i32) -> (i32, i32) {
    %c0_i32 = arith.constant 0 : i32
    return %arg0, %arg2 : i32, i32
  }
  func.func @transform_1(%arg0: i32, %arg1: i32, %arg2: i32) -> (i32, i32) {
    %c0_i32 = arith.constant 0 : i32
    return %arg1, %arg2 : i32, i32
  }
  func.func @transform_2(%arg0: i32, %arg1: i32, %arg2: i32) -> (i32, i32) {
    %c0_i32 = arith.constant 0 : i32
    return %arg1, %arg2 : i32, i32
  }
  func.func @transform_3(%arg0: i32, %arg1: i32, %arg2: i32) -> (i32, i32) {
    %c0_i32 = arith.constant 0 : i32
    %c0_i32_0 = arith.constant 0 : i32
    return %c0_i32, %arg2 : i32, i32
  }
  func.func @transform_4(%arg0: i32, %arg1: i32, %arg2: i32) -> (i32, i32) {
    %c0_i32 = arith.constant 0 : i32
    %c0_i32_0 = arith.constant 0 : i32
    return %c0_i32, %arg1 : i32, i32
  }
  func.func @transform_5(%arg0: i32, %arg1: i32, %arg2: i32) -> (i32, i32) {
    %c0_i32 = arith.constant 0 : i32
    %c0_i32_0 = arith.constant 0 : i32
    return %c0_i32, %arg1 : i32, i32
  }
  func.func @transform_6(%arg0: i32, %arg1: i32, %arg2: i32) -> (i32, i32) {
    %c0_i32 = arith.constant 0 : i32
    %c0_i32_0 = arith.constant 0 : i32
    return %c0_i32, %arg1 : i32, i32
  }
  func.func @transform_7(%arg0: i32, %arg1: i32, %arg2: i32) -> (i32, i32) {
    %c0_i32 = arith.constant 0 : i32
    %c0_i32_0 = arith.constant 0 : i32
    return %c0_i32, %arg1 : i32, i32
  }
  func.func @transform_8(%arg0: i32, %arg1: i32, %arg2: i32) -> (i32, i32) {
    %c0_i32 = arith.constant 0 : i32
    return %arg0, %arg1 : i32, i32
  }
}

</mosaic_0001>

<bundles_post_ra>
// kernel: noisy_linear.1
= control target key start
LH: loop header
LB: loop body
LE: loop exit
PB: predicated region body
PF: predicated region fallthrough
CT: control target
= control target key end

     0   :  { %13 = vsyncpa [#allocation3], 0  ;;  %s599_s0 = inlined_call_operand.vmem [shape: f32[8,128], index: 0, kind: input, shape index: {}]   ;;  %s600_s1 = inlined_call_operand.hbm [shape: f32[128,128], index: 1, kind: input, shape index: {}]   ;;  %s601_s2 = inlined_call_operand.hbm [shape: f32[128,128], index: 2, kind: input, shape index: {}]   ;;  %s602_s3 = inlined_call_operand.vmem [shape: f32[1,128], index: 3, kind: input, shape index: {}]   ;;  %s603_s4 = inlined_call_operand.vmem [shape: f32[1,128], index: 4, kind: input, shape index: {}]   ;;  %s604_s5 = inlined_call_operand.vmem [shape: f32[1,128], index: 5, kind: input, shape index: {}]   ;;  %s605_s6 = inlined_call_operand.vmem [shape: f32[1,128], index: 6, kind: input, shape index: {}]   ;;  %s606_s7 = inlined_call_operand.vmem [shape: f32[1,128], index: 7, kind: input, shape index: {}]   ;;  %s607_s8 = inlined_call_operand.vmem [shape: f32[8,128], index: 8, kind: output, shape index: {}]  }
   0x1   :  { %14 = vsyncpa [#allocation5], 0  ;;  %s486_s27 = smov [#allocation2]   ;;  %s438_s9 = scalar_lea.hbm %s600_s1, 2048 }
   0x2   :  { %s22_s28 = sshll.u32 %s486_s27, 4  ;;  %p439_p0 = scmp.ne.s32.totalorder %s600_s1, %s438_s9  ;;  %s23_s28 = int_to_ptr.vmem [resolvable:$true] %s22_s28 }
   0x3   :  { %p442_p1 = scmp.lt.u32.totalorder %s438_s9, %s600_s1 }
   0x5   :  { %p444_p2 = pnand %p442_p1, %p439_p0 }
   0x7   :  { %447 = shalt.err (!%p444_p2)
}
   0x8   :  { %s448_s14 = scalar_lea.vmem %s23_s28, 2048  ;;  %p453_p4 = scmp.lt.s32.totalorder %s23_s28, %s23_s28 }
   0x9   :  { %p449_p3 = scmp.ne.s32.totalorder %s23_s28, %s448_s14  ;;  %p454_p5 = scmp.lt.s32.totalorder %s448_s14, %s448_s14 }
   0xb   :  { %p455_p6 = por %p454_p5, %p453_p4 }
   0xd   :  { %p456_p7 = pnand %p455_p6, %p449_p3 }
   0xf   :  { %459 = shalt.err (!%p456_p7)
}
  0x10   :  { %s487_s15 = smov 128   ;;  %s488_s16 = smov 8  }
  0x11   :  { %28 = dma.hbm_to_vmem [thread:$0]  %s600_s1, 2048, %s23_s28, [#allocation3], %s487_s15, %s487_s15, %s488_s16  }
  0x12   :  { %s489_s19 = smov [#allocation4]   ;;  %s460_s23 = scalar_lea.hbm %s601_s2, 2048 }
  0x13   :  { %s34_s20 = sshll.u32 %s489_s19, 4  ;;  %p461_p8 = scmp.ne.s32.totalorder %s601_s2, %s460_s23  ;;  %s35_s20 = int_to_ptr.vmem [resolvable:$true] %s34_s20 }
  0x14   :  { %p464_p9 = scmp.lt.u32.totalorder %s460_s23, %s601_s2 }
  0x16   :  { %p466_p10 = pnand %p464_p9, %p461_p8 }
  0x18   :  { %469 = shalt.err (!%p466_p10)
}
  0x19   :  { %s470_s29 = scalar_lea.vmem %s35_s20, 2048  ;;  %p475_p12 = scmp.lt.s32.totalorder %s35_s20, %s35_s20 }
  0x1a   :  { %p471_p11 = scmp.ne.s32.totalorder %s35_s20, %s470_s29  ;;  %p476_p13 = scmp.lt.s32.totalorder %s470_s29, %s470_s29 }
  0x1c   :  { %p477_p0 = por %p476_p13, %p475_p12 }
  0x1e   :  { %p478_p1 = pnand %p477_p0, %p471_p11 }
  0x20   :  { %481 = shalt.err (!%p478_p1)
}
  0x21   :  { %40 = dma.hbm_to_vmem [thread:$0]  %s601_s2, 2048, %s35_s20, [#allocation5], %s487_s15, %s487_s15, %s488_s16  }
  0x22   :  { %482 = dma.done.wait [#allocation3], 2048  }
  0x23   :  { %483 = vsyncadd [#allocation3], 4294965248 }
  0x24   :  { %484 = dma.done.wait [#allocation5], 2048  }
  0x25   :  { %485 = vsyncadd [#allocation5], 4294965248  ;;  %v490_v0 = vmov 0.0|0.0   ;;  %vm491_vm0 = vmmov 0   ;;  %v492_v1 = vmov 0.0   ;;  %v87_v2 = vld [vmem:[#allocation4] sm:$0xff]  ;;  %v264_v53 = vlaneseq }
  0x26   :  { %383 = vmatprep.subr.bf16.mxu0 %v490_v0  ;;  %407 = vmatprep.subr.bf16.mxu1 %v490_v0  ;;  %v88_v3 = vld [vmem:[#allocation4 + $0x8] sm:$0xff]  ;;  %v63_v4 = vld [vmem:[#allocation2] sm:$0xff]  ;;  %v89_v8 = vld [vmem:[#allocation4 + $0x10] sm:$0xff] }
  0x27   :  { %345 = vmatprep.mubr.msk.f32.mxu0 %vm491_vm0, %v492_v1  ;;  %380 = vmatprep.mubr.msk.f32.mxu1 %vm491_vm0, %v492_v1  ;;  %v384_v5 = vpack.c.bf16 %v88_v3, %v87_v2  ;;  %v64_v6 = vld [vmem:[#allocation2 + $0x8] sm:$0xff]  ;;  %v90_v9 = vld [vmem:[#allocation4 + $0x18] sm:$0xff]  ;;  %v65_v10 = vld [vmem:[#allocation2 + $0x10] sm:$0xff]  ;;  %v265_v57 = vshrl.u32 %v264_v53, 7 }
  0x28   :  { %v408_v7 = vpack.c.bf16 %v64_v6, %v63_v4  ;;  %v66_v11 = vld [vmem:[#allocation2 + $0x18] sm:$0xff]  ;;  %v387_v12 = vpack.c.bf16 %v90_v9, %v89_v8  ;;  %v91_v14 = vld [vmem:[#allocation4 + $0x20] sm:$0xff]  ;;  %v92_v15 = vld [vmem:[#allocation4 + $0x28] sm:$0xff] }
  0x29   :  { %385 = vmatpush3.bf16.xpose.msra.mxu0 %v384_v5  ;;  %v411_v13 = vpack.c.bf16 %v66_v11, %v65_v10  ;;  %v67_v16 = vld [vmem:[#allocation2 + $0x20] sm:$0xff]  ;;  %v68_v17 = vld [vmem:[#allocation2 + $0x28] sm:$0xff]  ;;  %v390_v18 = vpack.c.bf16 %v92_v15, %v91_v14  ;;  %v93_v20 = vld [vmem:[#allocation4 + $0x30] sm:$0xff]  ;;  %v266_v61 = vsub.s32 0, %v265_v57 }
  0x2a   :  { %409 = vmatpush3.bf16.xpose.msra.mxu1 %v408_v7  ;;  %386 = vmatprep.subr.bf16.mxu0 %v490_v0  ;;  %v414_v19 = vpack.c.bf16 %v68_v17, %v67_v16  ;;  %v94_v21 = vld [vmem:[#allocation4 + $0x38] sm:$0xff]  ;;  %v69_v22 = vld [vmem:[#allocation2 + $0x30] sm:$0xff]  ;;  %v95_v26 = vld [vmem:[#allocation4 + $0x40] sm:$0xff] }
  0x2b   :  { %410 = vmatprep.subr.bf16.mxu1 %v490_v0  ;;  %v70_v23 = vld [vmem:[#allocation2 + $0x38] sm:$0xff]  ;;  %v393_v24 = vpack.c.bf16 %v94_v21, %v93_v20  ;;  %v96_v27 = vld [vmem:[#allocation4 + $0x48] sm:$0xff]  ;;  %v71_v28 = vld [vmem:[#allocation2 + $0x40] sm:$0xff] }
  0x2c   :  { %v417_v25 = vpack.c.bf16 %v70_v23, %v69_v22  ;;  %v72_v29 = vld [vmem:[#allocation2 + $0x48] sm:$0xff]  ;;  %v396_v30 = vpack.c.bf16 %v96_v27, %v95_v26  ;;  %v97_v32 = vld [vmem:[#allocation4 + $0x50] sm:$0xff]  ;;  %v98_v33 = vld [vmem:[#allocation4 + $0x58] sm:$0xff] }
  0x2d   :  { %v420_v31 = vpack.c.bf16 %v72_v29, %v71_v28  ;;  %v73_v34 = vld [vmem:[#allocation2 + $0x50] sm:$0xff]  ;;  %v74_v35 = vld [vmem:[#allocation2 + $0x58] sm:$0xff]  ;;  %v399_v36 = vpack.c.bf16 %v98_v33, %v97_v32  ;;  %v99_v38 = vld [vmem:[#allocation4 + $0x60] sm:$0xff] }
  0x2e   :  { %v423_v37 = vpack.c.bf16 %v74_v35, %v73_v34  ;;  %v100_v39 = vld [vmem:[#allocation4 + $0x68] sm:$0xff]  ;;  %v75_v40 = vld [vmem:[#allocation2 + $0x60] sm:$0xff]  ;;  %v101_v44 = vld [vmem:[#allocation4 + $0x70] sm:$0xff] }
  0x2f   :  { %v76_v41 = vld [vmem:[#allocation2 + $0x68] sm:$0xff]  ;;  %v402_v42 = vpack.c.bf16 %v100_v39, %v99_v38  ;;  %v102_v45 = vld [vmem:[#allocation4 + $0x78] sm:$0xff]  ;;  %v77_v46 = vld [vmem:[#allocation2 + $0x70] sm:$0xff] }
  0x30   :  { %v426_v43 = vpack.c.bf16 %v76_v41, %v75_v40  ;;  %v78_v47 = vld [vmem:[#allocation2 + $0x78] sm:$0xff]  ;;  %v405_v48 = vpack.c.bf16 %v102_v45, %v101_v44  ;;  %v62_v50 = vld [vmem:[%s599_s0] sm:$0xff] }
  0x31   :  { %388 = vmatpush3.bf16.xpose.msra.mxu0 %v387_v12  ;;  %v429_v49 = vpack.c.bf16 %v78_v47, %v77_v46  ;;  %v277_v51 = vld [vmem:[%s602_s3] ss:$0 sm:$0xff] }
  0x32   :  { %412 = vmatpush3.bf16.xpose.msra.mxu1 %v411_v13  ;;  %389 = vmatprep.subr.bf16.mxu0 %v490_v0  ;;  %v86_v52 = vmul.f32 %v277_v51, %v62_v50  ;;  %v259_v54 = vld [vmem:[%s605_s6] sm:$0x1] }
  0x33   :  { %413 = vmatprep.subr.bf16.mxu1 %v490_v0  ;;  %v260_v55 = vld [vmem:[%s606_s7] sm:$0x1] }
  0x34   :  { %v261_v56 = vmul.f32 %v260_v55, %v259_v54  ;;  %v258_v58 = vld [vmem:[%s604_s5] sm:$0x1] }
  0x35   :  { %v278_v59 = vld [vmem:[%s603_s4] ss:$0 sm:$0xff] }
  0x36   :  { %v262_v60 = vadd.f32 %v261_v56, %v258_v58 }
  0x38   :  { %v267_v4 = vrot.slane %v262_v60, %v266_v61 }
  0x39   :  { %391 = vmatpush3.bf16.xpose.msra.mxu0 %v390_v18 }
  0x3a   :  { %415 = vmatpush3.bf16.xpose.msra.mxu1 %v414_v19  ;;  %392 = vmatprep.subr.bf16.mxu0 %v490_v0 }
  0x3b   :  { %416 = vmatprep.subr.bf16.mxu1 %v490_v0 }
  0x41   :  { %394 = vmatpush3.bf16.xpose.msra.mxu0 %v393_v24 }
  0x42   :  { %418 = vmatpush3.bf16.xpose.msra.mxu1 %v417_v25  ;;  %395 = vmatprep.subr.bf16.mxu0 %v490_v0 }
  0x43   :  { %419 = vmatprep.subr.bf16.mxu1 %v490_v0 }
  0x49   :  { %397 = vmatpush3.bf16.xpose.msra.mxu0 %v396_v30 }
  0x4a   :  { %421 = vmatpush3.bf16.xpose.msra.mxu1 %v420_v31  ;;  %398 = vmatprep.subr.bf16.mxu0 %v490_v0 }
  0x4b   :  { %422 = vmatprep.subr.bf16.mxu1 %v490_v0 }
  0x51   :  { %400 = vmatpush3.bf16.xpose.msra.mxu0 %v399_v36 }
  0x52   :  { %424 = vmatpush3.bf16.xpose.msra.mxu1 %v423_v37  ;;  %401 = vmatprep.subr.bf16.mxu0 %v490_v0 }
  0x53   :  { %425 = vmatprep.subr.bf16.mxu1 %v490_v0 }
  0x59   :  { %403 = vmatpush3.bf16.xpose.msra.mxu0 %v402_v42 }
  0x5a   :  { %427 = vmatpush3.bf16.xpose.msra.mxu1 %v426_v43  ;;  %404 = vmatprep.subr.bf16.mxu0 %v490_v0 }
  0x5b   :  { %428 = vmatprep.subr.bf16.mxu1 %v490_v0 }
  0x61   :  { %406 = vmatpush3.bf16.xpose.msra.mxu0 %v405_v48 }
  0x62   :  { %430 = vmatpush3.bf16.xpose.msra.mxu1 %v429_v49 }
  0x68   :  { %346 = vmatmul.mubr.f32.vlgmr.msra.gmra.mrb[0].mxu0 %v86_v52 }
  0x69   :  { %381 = vmatmul.mubr.f32.vlgmr.msra.gmra.mrb[0].mxu1 %v62_v50 }
 0x13b   :  { %v169_v62 = vpop.f32.mrb[0].mxu0 }
 0x13c   :  { %v181_v63 = vmul.f32 %v278_v59, %v169_v62  ;;  %v347_v0 = vpop.f32.mrb[1].mxu0  ;;  %v248_v1 = vpop.f32.mrb[0].mxu1 }
 0x13d   :  { %v382_v2 = vpop.f32.mrb[1].mxu1 }
 0x13e   :  { %v249_v3 = vadd.f32 %v248_v1, %v181_v63 }
 0x140   :  { %v269_v5 = vadd.f32 %v267_v4, %v249_v3 }
 0x142   :  { %270 = vst [vmem:[%s607_s8] sm:$0xff] %v269_v5 }
 0x143   :  { %275 = vsyncpa [#allocation3], 1 }
 0x144   :  { %276 = vsyncpa [#allocation5], 1 }

</bundles_post_ra>
